<compile_context>
chip_gen: v7x
topology: tpu7x:2x2x1
jax: 0.10.0
libtpu: 0.0.40
codegen_flags: <defaults>
</compile_context>

<pallas_src>
import math
import functools

import jax
import jax.numpy as jnp
from jax.experimental import pallas as pl
from jax.experimental.pallas import tpu as pltpu

LOG_STD_MIN = -20.0
LOG_STD_MAX = 2.0
_LOG2 = math.log(2.0)
_LOG_SQRT_2PI = math.log(math.sqrt(2.0 * math.pi))


def _softplus(x):
    # numerically stable softplus
    return jnp.maximum(x, 0.0) + jnp.log1p(jnp.exp(-jnp.abs(x)))


def _dot(a, b, use_bf16):
    if use_bf16:
        a = a.astype(jnp.bfloat16)
        b = b.astype(jnp.bfloat16)
    return jnp.dot(a, b, preferred_element_type=jnp.float32)


def actor_fc_kernel(*refs, act_limit, act_dim, h1, h2, deterministic, trunk_bf16):
    if deterministic:
        s_ref, w1_ref, w2_ref, wh_ref, bias_ref, out_ref = refs
        eps_ref = None
    else:
        s_ref, eps_ref, w1_ref, w2_ref, wh_ref, bias_ref, out_ref = refs

    s = s_ref[...]
    bias = bias_ref[...]                       # [1, H1+H2+2A], one vreg row
    b1 = bias[:, 0:h1]
    b2 = bias[:, h1:h1 + h2]
    bh = bias[:, h1 + h2:h1 + h2 + 2 * act_dim]

    # MLP trunk: Linear -> ReLU -> Linear -> ReLU
    h = jnp.maximum(_dot(s, w1_ref[...], trunk_bf16) + b1, 0.0)
    h = jnp.maximum(_dot(h, w2_ref[...], trunk_bf16) + b2, 0.0)

    # fused heads: one [H2, 2*act_dim] matmul, split lanes statically
    head = jnp.dot(h, wh_ref[...], preferred_element_type=jnp.float32) + bh
    mu = head[:, :act_dim]
    logstd = jnp.clip(head[:, act_dim:], LOG_STD_MIN, LOG_STD_MAX)

    if deterministic:
        a_pre = mu
        quad = jnp.zeros_like(mu)              # -(a_pre - mu)^2 / (2 var) == 0
    else:
        eps = eps_ref[...]
        std = jnp.exp(logstd)
        a_pre = mu + eps * std                 # rsample
        quad = -0.5 * (eps * eps)              # exact form of -(a-mu)^2/(2 var)

    # Gaussian log-prob + tanh-squash correction, single lane reduce
    corr = 2.0 * (_LOG2 - a_pre - _softplus(-2.0 * a_pre))
    per_dim = quad - logstd - _LOG_SQRT_2PI - corr
    logp = jnp.sum(per_dim, axis=-1, keepdims=True)

    a = jnp.tanh(a_pre) * act_limit
    out_ref[...] = jnp.concatenate([a, logp], axis=-1)   # one lane-dense store


def pack_params(params):
    """Pack per-layer weights/biases into the fused kernel layout (do once)."""
    whead = jnp.concatenate([params["wmu"], params["wstd"]], axis=1)
    bias = jnp.concatenate(
        [params["b1"], params["b2"], params["bmu"], params["bstd"]], axis=1)
    return dict(w1=params["w1"], w2=params["w2"], whead=whead, bias=bias)


def actor_fc_forward(s, eps, packed, act_limit, deterministic=False,
                     tile_b=256, trunk_bf16=False):
    B, obs_dim = s.shape
    w1, w2, wh, bias = packed["w1"], packed["w2"], packed["whead"], packed["bias"]
    h1 = w1.shape[1]
    h2 = w2.shape[1]
    act_dim = wh.shape[1] // 2

    # batch tiling: grid over B (parallel -> uses both TCs on v7x for large B)
    tb = B if B <= tile_b else tile_b
    num_tiles = (B + tb - 1) // tb
    Bp = num_tiles * tb
    if Bp != B:
        s = jnp.pad(s, ((0, Bp - B), (0, 0)))
        if not deterministic:
            eps = jnp.pad(eps, ((0, Bp - B), (0, 0)))

    kernel = functools.partial(
        actor_fc_kernel, act_limit=float(act_limit), act_dim=act_dim,
        h1=h1, h2=h2, deterministic=bool(deterministic),
        trunk_bf16=bool(trunk_bf16))

    def batch_spec(d):
        return pl.BlockSpec((tb, d), lambda i: (i, 0))

    def const_spec(shape):
        return pl.BlockSpec(shape, lambda i: (0, 0))

    in_specs = [batch_spec(obs_dim)]
    args = [s]
    if not deterministic:
        in_specs.append(batch_spec(act_dim))
        args.append(eps)
    in_specs += [const_spec(w1.shape), const_spec(w2.shape),
                 const_spec(wh.shape), const_spec(bias.shape)]
    args += [w1, w2, wh, bias]

    flops = 2 * Bp * (obs_dim * h1 + h1 * h2 + h2 * 2 * act_dim)
    bytes_in = 4 * (s.size + (0 if deterministic else Bp * act_dim)
                    + w1.size + w2.size + wh.size + bias.size)
    bytes_out = 4 * Bp * (act_dim + 1)

    out = pl.pallas_call(
        kernel,
        out_shape=jax.ShapeDtypeStruct((Bp, act_dim + 1), jnp.float32),
        grid=(num_tiles,),
        in_specs=in_specs,
        out_specs=pl.BlockSpec((tb, act_dim + 1), lambda i: (i, 0)),
        compiler_params=pltpu.CompilerParams(
            dimension_semantics=("parallel",)),
        cost_estimate=pl.CostEstimate(
            flops=flops,
            transcendentals=4 * Bp * act_dim,
            bytes_accessed=bytes_in + bytes_out),
    )(*args)

    a = out[:B, :act_dim]
    logp = out[:B, act_dim]
    return a, logp


def init_params(key, obs_dim, hidden_sizes, act_dim):
    """Deterministic synthetic init (uniform, like PyTorch default fan-in bound)."""
    sizes = [obs_dim] + list(hidden_sizes)
    keys = jax.random.split(key, 4)

    def lin(k, fan_in, fan_out):
        bound = 1.0 / math.sqrt(fan_in)
        kw, kb = jax.random.split(k)
        w = jax.random.uniform(kw, (fan_in, fan_out), jnp.float32, -bound, bound)
        b = jax.random.uniform(kb, (1, fan_out), jnp.float32, -bound, bound)
        return w, b

    w1, b1 = lin(keys[0], sizes[0], sizes[1])
    w2, b2 = lin(keys[1], sizes[1], sizes[2])
    wmu, bmu = lin(keys[2], sizes[2], act_dim)
    wstd, bstd = lin(keys[3], sizes[2], act_dim)
    return dict(w1=w1, b1=b1, w2=w2, b2=b2, wmu=wmu, bmu=bmu, wstd=wstd, bstd=bstd)


def reference_forward(s, eps, p, act_limit, deterministic=False):
    """Plain-JAX reference mirroring the PyTorch module exactly."""
    h = jax.nn.relu(s @ p["w1"] + p["b1"])
    h = jax.nn.relu(h @ p["w2"] + p["b2"])
    mu = h @ p["wmu"] + p["bmu"]
    logstd = jnp.clip(h @ p["wstd"] + p["bstd"], LOG_STD_MIN, LOG_STD_MAX)
    std = jnp.exp(logstd)
    a_pre = mu if deterministic else mu + eps * std
    lp = -(a_pre - mu) ** 2 / (2.0 * std ** 2) - logstd - _LOG_SQRT_2PI
    logp = jnp.sum(lp, axis=-1)
    logp -= jnp.sum(2.0 * (_LOG2 - a_pre - jax.nn.softplus(-2.0 * a_pre)), axis=-1)
    return jnp.tanh(a_pre) * act_limit, logp


if __name__ == "__main__":
    B, obs_dim, act_dim = 8, 16, 8
    hidden_sizes = (32, 32)
    act_limit = 2.0

    key = jax.random.PRNGKey(0)
    kp, ks, ke = jax.random.split(key, 3)
    params = init_params(kp, obs_dim, hidden_sizes, act_dim)
    packed = pack_params(params)
    s = jax.random.normal(ks, (B, obs_dim), jnp.float32)
    eps = jax.random.normal(ke, (B, act_dim), jnp.float32)  # rsample noise

    # stochastic path
    a, logp = actor_fc_forward(s, eps, packed, act_limit, deterministic=False)
    jax.block_until_ready((a, logp))
    a_ref, logp_ref = reference_forward(s, eps, params, act_limit, deterministic=False)
    assert a.shape == (B, act_dim) and logp.shape == (B,)
    assert jnp.allclose(a, a_ref, atol=1e-5, rtol=1e-5)
    assert jnp.allclose(logp, logp_ref, atol=5e-4, rtol=1e-4)

    # deterministic path (eps not passed to / DMA'd by the kernel)
    a_d, logp_d = actor_fc_forward(s, None, packed, act_limit, deterministic=True)
    jax.block_until_ready((a_d, logp_d))
    a_dref, logp_dref = reference_forward(s, eps, params, act_limit, deterministic=True)
    assert jnp.allclose(a_d, a_dref, atol=1e-5, rtol=1e-5)
    assert jnp.allclose(logp_d, logp_dref, atol=5e-4, rtol=1e-4)

    print("KERNEL_OK")
</pallas_src>

<mosaic_0001>
module attributes {stable_mosaic.version = 11 : i64} {
  func.func @actor_fc_kernel(%arg0: i32, %arg1: memref<8x16xf32, #tpu.memory_space<vmem>>, %arg2: memref<8x8xf32, #tpu.memory_space<vmem>>, %arg3: memref<16x32xf32, #tpu.memory_space<vmem>>, %arg4: memref<32x32xf32, #tpu.memory_space<vmem>>, %arg5: memref<32x16xf32, #tpu.memory_space<vmem>>, %arg6: memref<1x80xf32, #tpu.memory_space<vmem>>, %arg7: memref<8x9xf32, #tpu.memory_space<vmem>>) attributes {dimension_semantics = [#tpu.dimension_semantics<parallel>], iteration_bounds = array<i64: 1>, scalar_prefetch = 0 : i64, scratch_operands = 0 : i64, tpu.core_type = #tpu.core_type<tc>, window_params = [{transform_indices = @transform_0, window_bounds = array<i64: 8, 16>}, {transform_indices = @transform_1, window_bounds = array<i64: 8, 8>}, {pipeline_mode = #tpu.pipeline_mode<synchronous>, transform_indices = @transform_2, window_bounds = array<i64: 16, 32>}, {pipeline_mode = #tpu.pipeline_mode<synchronous>, transform_indices = @transform_3, window_bounds = array<i64: 32, 32>}, {pipeline_mode = #tpu.pipeline_mode<synchronous>, transform_indices = @transform_4, window_bounds = array<i64: 32, 16>}, {pipeline_mode = #tpu.pipeline_mode<synchronous>, transform_indices = @transform_5, window_bounds = array<i64: 1, 80>}, {transform_indices = @transform_6, window_bounds = array<i64: 8, 9>}]} {
    %c0 = arith.constant 0 : index
    %c0_0 = arith.constant 0 : index
    %0 = vector.load %arg1[%c0, %c0_0] : memref<8x16xf32, #tpu.memory_space<vmem>>, vector<8x16xf32>
    %c0_1 = arith.constant 0 : index
    %c0_2 = arith.constant 0 : index
    %1 = vector.load %arg6[%c0_1, %c0_2] : memref<1x80xf32, #tpu.memory_space<vmem>>, vector<1x80xf32>
    %2 = vector.extract_strided_slice %1 {offsets = [0, 0], sizes = [1, 32], strides = [1, 1]} : vector<1x80xf32> to vector<1x32xf32>
    %3 = vector.extract_strided_slice %1 {offsets = [0, 32], sizes = [1, 32], strides = [1, 1]} : vector<1x80xf32> to vector<1x32xf32>
    %4 = vector.extract_strided_slice %1 {offsets = [0, 64], sizes = [1, 16], strides = [1, 1]} : vector<1x80xf32> to vector<1x16xf32>
    %c0_3 = arith.constant 0 : index
    %c0_4 = arith.constant 0 : index
    %5 = vector.load %arg3[%c0_3, %c0_4] : memref<16x32xf32, #tpu.memory_space<vmem>>, vector<16x32xf32>
    %cst = arith.constant dense<0.000000e+00> : vector<8x32xf32>
    %6 = tpu.matmul %0, %5, %cst {dimension_numbers = #tpu.dot_dimension_numbers<[1], [0], [0], [1], [0, 0, 1, 1], [], []>} : vector<8x16xf32>, vector<16x32xf32>, vector<8x32xf32> -> vector<8x32xf32>
    %7 = vector.broadcast %2 : vector<1x32xf32> to vector<8x32xf32>
    %8 = arith.addf %6, %7 : vector<8x32xf32>
    %cst_5 = arith.constant 0.000000e+00 : f32
    %9 = vector.broadcast %cst_5 : f32 to vector<8x32xf32>
    %10 = arith.maximumf %8, %9 : vector<8x32xf32>
    %c0_6 = arith.constant 0 : index
    %c0_7 = arith.constant 0 : index
    %11 = vector.load %arg4[%c0_6, %c0_7] : memref<32x32xf32, #tpu.memory_space<vmem>>, vector<32x32xf32>
    %cst_8 = arith.constant dense<0.000000e+00> : vector<8x32xf32>
    %12 = tpu.matmul %10, %11, %cst_8 {dimension_numbers = #tpu.dot_dimension_numbers<[1], [0], [0], [1], [0, 0, 1, 1], [], []>} : vector<8x32xf32>, vector<32x32xf32>, vector<8x32xf32> -> vector<8x32xf32>
    %13 = vector.broadcast %3 : vector<1x32xf32> to vector<8x32xf32>
    %14 = arith.addf %12, %13 : vector<8x32xf32>
    %cst_9 = arith.constant 0.000000e+00 : f32
    %15 = vector.broadcast %cst_9 : f32 to vector<8x32xf32>
    %16 = arith.maximumf %14, %15 : vector<8x32xf32>
    %c0_10 = arith.constant 0 : index
    %c0_11 = arith.constant 0 : index
    %17 = vector.load %arg5[%c0_10, %c0_11] : memref<32x16xf32, #tpu.memory_space<vmem>>, vector<32x16xf32>
    %cst_12 = arith.constant dense<0.000000e+00> : vector<8x16xf32>
    %18 = tpu.matmul %16, %17, %cst_12 {dimension_numbers = #tpu.dot_dimension_numbers<[1], [0], [0], [1], [0, 0, 1, 1], [], []>} : vector<8x32xf32>, vector<32x16xf32>, vector<8x16xf32> -> vector<8x16xf32>
    %19 = vector.broadcast %4 : vector<1x16xf32> to vector<8x16xf32>
    %20 = arith.addf %18, %19 : vector<8x16xf32>
    %21 = vector.extract_strided_slice %20 {offsets = [0, 0], sizes = [8, 8], strides = [1, 1]} : vector<8x16xf32> to vector<8x8xf32>
    %22 = vector.extract_strided_slice %20 {offsets = [0, 8], sizes = [8, 8], strides = [1, 1]} : vector<8x16xf32> to vector<8x8xf32>
    %cst_13 = arith.constant -2.000000e+01 : f32
    %cst_14 = arith.constant 2.000000e+00 : f32
    %23 = vector.broadcast %cst_13 : f32 to vector<8x8xf32>
    %24 = arith.maximumf %23, %22 : vector<8x8xf32>
    %25 = vector.broadcast %cst_14 : f32 to vector<8x8xf32>
    %26 = arith.minimumf %25, %24 : vector<8x8xf32>
    %c0_15 = arith.constant 0 : index
    %c0_16 = arith.constant 0 : index
    %27 = vector.load %arg2[%c0_15, %c0_16] : memref<8x8xf32, #tpu.memory_space<vmem>>, vector<8x8xf32>
    %28 = math.exp %26 : vector<8x8xf32>
    %29 = arith.mulf %27, %28 : vector<8x8xf32>
    %30 = arith.addf %21, %29 : vector<8x8xf32>
    %31 = arith.mulf %27, %27 : vector<8x8xf32>
    %cst_17 = arith.constant -5.000000e-01 : f32
    %32 = vector.broadcast %cst_17 : f32 to vector<8x8xf32>
    %33 = arith.mulf %32, %31 : vector<8x8xf32>
    %cst_18 = arith.constant 0.693147182 : f32
    %34 = vector.broadcast %cst_18 : f32 to vector<8x8xf32>
    %35 = arith.subf %34, %30 : vector<8x8xf32>
    %cst_19 = arith.constant -2.000000e+00 : f32
    %36 = vector.broadcast %cst_19 : f32 to vector<8x8xf32>
    %37 = arith.mulf %36, %30 : vector<8x8xf32>
    %cst_20 = arith.constant 0.000000e+00 : f32
    %38 = vector.broadcast %cst_20 : f32 to vector<8x8xf32>
    %39 = arith.maximumf %37, %38 : vector<8x8xf32>
    %40 = math.absf %37 : vector<8x8xf32>
    %cst_21 = arith.constant 0.000000e+00 : f32
    %41 = vector.broadcast %cst_21 : f32 to vector<8x8xf32>
    %42 = arith.subf %41, %40 : vector<8x8xf32>
    %43 = math.exp %42 : vector<8x8xf32>
    %44 = math.log1p %43 : vector<8x8xf32>
    %45 = arith.addf %39, %44 : vector<8x8xf32>
    %46 = arith.subf %35, %45 : vector<8x8xf32>
    %cst_22 = arith.constant 2.000000e+00 : f32
    %47 = vector.broadcast %cst_22 : f32 to vector<8x8xf32>
    %48 = arith.mulf %47, %46 : vector<8x8xf32>
    %49 = arith.subf %33, %26 : vector<8x8xf32>
    %cst_23 = arith.constant 0.918938517 : f32
    %50 = vector.broadcast %cst_23 : f32 to vector<8x8xf32>
    %51 = arith.subf %49, %50 : vector<8x8xf32>
    %52 = arith.subf %51, %48 : vector<8x8xf32>
    %cst_24 = arith.constant dense<0.000000e+00> : vector<8xf32>
    %53 = vector.multi_reduction <add>, %52, %cst_24 [1] : vector<8x8xf32> to vector<8xf32>
    %54 = vector.shape_cast %53 : vector<8xf32> to vector<8x1xf32>
    %55 = math.tanh %30 : vector<8x8xf32>
    %cst_25 = arith.constant 2.000000e+00 : f32
    %56 = vector.broadcast %cst_25 : f32 to vector<8x8xf32>
    %57 = arith.mulf %55, %56 : vector<8x8xf32>
    %58 = tpu.concatenate %57, %54 in 1 : vector<8x8xf32>, vector<8x1xf32> -> vector<8x9xf32>
    %c0_26 = arith.constant 0 : index
    %c0_27 = arith.constant 0 : index
    %59 = vector.load %arg7[%c0_26, %c0_27] : memref<8x9xf32, #tpu.memory_space<vmem>>, vector<8x9xf32>
    tpu.vector_store %arg7[%c0_26, %c0_27], %58 {strides = array<i32>} : memref<8x9xf32, #tpu.memory_space<vmem>>, vector<8x9xf32>,
    return
  }
  func.func @transform_0(%arg0: i32) -> (i32, i32) {
    %c0_i32 = arith.constant 0 : i32
    %c0_i32_0 = arith.constant 0 : i32
    return %arg0, %c0_i32 : i32, i32
  }
  func.func @transform_1(%arg0: i32) -> (i32, i32) {
    %c0_i32 = arith.constant 0 : i32
    %c0_i32_0 = arith.constant 0 : i32
    return %arg0, %c0_i32 : i32, i32
  }
  func.func @transform_2(%arg0: i32) -> (i32, i32) {
    %c0_i32 = arith.constant 0 : i32
    %c0_i32_0 = arith.constant 0 : i32
    %c0_i32_1 = arith.constant 0 : i32
    return %c0_i32, %c0_i32_0 : i32, i32
  }
  func.func @transform_3(%arg0: i32) -> (i32, i32) {
    %c0_i32 = arith.constant 0 : i32
    %c0_i32_0 = arith.constant 0 : i32
    %c0_i32_1 = arith.constant 0 : i32
    return %c0_i32, %c0_i32_0 : i32, i32
  }
  func.func @transform_4(%arg0: i32) -> (i32, i32) {
    %c0_i32 = arith.constant 0 : i32
    %c0_i32_0 = arith.constant 0 : i32
    %c0_i32_1 = arith.constant 0 : i32
    return %c0_i32, %c0_i32_0 : i32, i32
  }
  func.func @transform_5(%arg0: i32) -> (i32, i32) {
    %c0_i32 = arith.constant 0 : i32
    %c0_i32_0 = arith.constant 0 : i32
    %c0_i32_1 = arith.constant 0 : i32
    return %c0_i32, %c0_i32_0 : i32, i32
  }
  func.func @transform_6(%arg0: i32) -> (i32, i32) {
    %c0_i32 = arith.constant 0 : i32
    %c0_i32_0 = arith.constant 0 : i32
    return %arg0, %c0_i32 : i32, i32
  }
}

</mosaic_0001>

<bundles_post_ra>
// kernel: tpu_custom_call.1
= control target key start
LH: loop header
LB: loop body
LE: loop exit
PB: predicated region body
PF: predicated region fallthrough
CT: control target
= control target key end

     0   :  { %11 = vsyncpa [#allocation3], 0  ;;  %s578_s0 = inlined_call_operand.vmem [shape: f32[8,16], index: 0, kind: input, shape index: {}]   ;;  %s579_s1 = inlined_call_operand.hbm [shape: f32[8,8], index: 1, kind: input, shape index: {}]   ;;  %s580_s2 = inlined_call_operand.vmem [shape: f32[16,32], index: 2, kind: input, shape index: {}]   ;;  %s581_s3 = inlined_call_operand.vmem [shape: f32[32,32], index: 3, kind: input, shape index: {}]   ;;  %s582_s4 = inlined_call_operand.vmem [shape: f32[32,16], index: 4, kind: input, shape index: {}]   ;;  %s583_s5 = inlined_call_operand.vmem [shape: f32[1,80], index: 5, kind: input, shape index: {}]   ;;  %s584_s6 = inlined_call_operand.hbm [shape: f32[8,9], index: 6, kind: output, shape index: {}]  }
   0x1   :  { %12 = vsyncpa [#allocation4], 0  ;;  %s472_s21 = smov [#allocation2]   ;;  %s424_s25 = scalar_lea.hbm %s579_s1, 128 }
   0x2   :  { %s21_s22 = sshll.u32 %s472_s21, 4  ;;  %p425_p0 = scmp.ne.s32.totalorder %s579_s1, %s424_s25  ;;  %s22_s22 = int_to_ptr.vmem [resolvable:$true] %s21_s22 }
   0x3   :  { %p428_p1 = scmp.lt.u32.totalorder %s424_s25, %s579_s1 }
   0x5   :  { %p430_p2 = pnand %p428_p1, %p425_p0 }
   0x7   :  { %433 = shalt.err (!%p430_p2)
}
   0x8   :  { %s434_s30 = scalar_lea.vmem %s22_s22, 128  ;;  %p439_p4 = scmp.lt.s32.totalorder %s22_s22, %s22_s22 }
   0x9   :  { %p435_p3 = scmp.ne.s32.totalorder %s22_s22, %s434_s30  ;;  %p440_p5 = scmp.lt.s32.totalorder %s434_s30, %s434_s30 }
   0xb   :  { %p441_p6 = por %p440_p5, %p439_p4 }
   0xd   :  { %p442_p7 = pnand %p441_p6, %p435_p3 }
   0xf   :  { %445 = shalt.err (!%p442_p7)
}
  0x10   :  { %24 = dma.hbm_to_vmem [thread:$0]  %s579_s1, 128, %s22_s22, [#allocation3]  }
  0x11   :  { %468 = dma.done.wait [#allocation3], 128  }
  0x12   :  { %469 = vsyncadd [#allocation3], 4294967168  ;;  %v473_v0 = vmov 0.0|0.0   ;;  %vm474_vm0 = vmmov 0   ;;  %v475_v1 = vmov 0.0   ;;  %v38_v2 = vld [vmem:[%s580_s2] sm:$0xff] }
  0x13   :  { %393 = vmatprep.subr.bf16.mxu0 %v473_v0  ;;  %368 = vmatprep.mubr.msk.f32.mxu0 %vm474_vm0, %v475_v1  ;;  %v39_v3 = vld [vmem:[%s580_s2 + $0x8] sm:$0xff]  ;;  %v121_v5 = vld [vmem:[%s581_s3] sm:$0xff]  ;;  %vm46_vm1 = vcmask 130048   ;;  %v123_v9 = vld [vmem:[%s581_s3 + $0x10] sm:$0xff]  ;;  %s476_s26 = smov 96   ;;  %vm128_vm2 = vcmask 261120  }
  0x14   :  { %396 = vmatprep.subr.bf16.mxu1 %v473_v0  ;;  %379 = vmatprep.mubr.msk.f32.mxu1 %vm474_vm0, %v475_v1  ;;  %v394_v4 = vpack.c.bf16 %v39_v3, %v38_v2  ;;  %v122_v6 = vld [vmem:[%s581_s3 + $0x8] sm:$0xff]  ;;  %v36_v8 = vld [vmem:[%s578_s0] sm:$0xff]  ;;  %v124_v10 = vld [vmem:[%s581_s3 + $0x18] sm:$0xff]  ;;  %s477_s29 = smov 64   ;;  %vm322_vm4 = vcmask 64512   ;;  %s479_s30 = smov [#allocation5]  }
  0x15   :  { %v397_v7 = vpack.c.bf16 %v122_v6, %v121_v5  ;;  %v400_v11 = vpack.c.bf16 %v124_v10, %v123_v9  ;;  %v346_v12 = vld [vmem:[%s583_s5] ss:$0 sm:$0xff]  ;;  %v204_v14 = vld [vmem:[%s582_s4 + $0x8] sm:$0xff]  ;;  %v205_v20 = vld [vmem:[%s582_s4 + $0x10] sm:$0xff]  ;;  %s337_s7 = sshll.u32 %s479_s30, 4  ;;  %vm329_vm5 = vcmask 72704   ;;  %s338_s7 = int_to_ptr.vmem [resolvable:$true] %s337_s7 }
  0x16   :  { %395 = vmatpush3.bf16.msra.mxu0 %v394_v4  ;;  %v203_v13 = vld [vmem:[%s582_s4] sm:$0xff]  ;;  %125 = vrot.lane.b32.xlu0 %v346_v12, %s476_s26  ;;  %v206_v21 = vld [vmem:[%s582_s4 + $0x18] sm:$0xff]  ;;  %s478_s4 = smov 120   ;;  %s446_s8 = scalar_lea.vmem %s338_s7, 128 }
  0x17   :  { %398 = vmatpush3.bf16.msra.mxu1 %v397_v7  ;;  %402 = vmatprep.subr.bf16.mxu0 %v473_v0  ;;  %v403_v15 = vpack.c.bf16 %v204_v14, %v203_v13  ;;  %v406_v22 = vpack.c.bf16 %v206_v21, %v205_v20  ;;  %v285_v36 = vld [vmem:[#allocation2] sm:$0xff]  ;;  %p447_p8 = scmp.ne.s32.totalorder %s338_s7, %s446_s8  ;;  %p451_p9 = scmp.lt.s32.totalorder %s338_s7, %s338_s7 }
  0x18   :  { %399 = vmatprep.subr.bf16.mxu1 %v473_v0  ;;  %v294_v47 = vmul.f32 %v285_v36, %v285_v36  ;;  %p452_p10 = scmp.lt.s32.totalorder %s446_s8, %s446_s8 }
  0x19   :  { %369 = vmatmul.mubr.msk.f32.vlgmr.msra.gmra.mrb[0].mxu0 %vm46_vm1, %v36_v8 }
  0x1a   :  { %390 = vmatprep.mubr.msk.f32.mxu0 %vm474_vm0, %v475_v1  ;;  %404 = vmatpush3.bf16.msra.mxu0 %v403_v15  ;;  %v295_v51 = vmul.f32 -0.5, %v294_v47  ;;  %p453_p11 = por %p452_p10, %p451_p9 }
  0x1b   :  { %401 = vmatpush3.bf16.msra.mxu1 %v400_v11  ;;  %405 = vmatprep.subr.bf16.mxu0 %v473_v0 }
  0x1c   :  { %207 = vrot.lane.b32.xlu0 %v346_v12, %s477_s29  ;;  %p454_p12 = pnand %p453_p11, %p447_p8 }
  0x1e   :  { %407 = vmatpush3.bf16.msra.mxu0 %v406_v22 }
  0x88   :  { %v126_v23 = vpop.permute.xlu0 %125 }
  0x8e   :  { %v208_v28 = vpop.permute.xlu0 %207 }
  0xec   :  { %v116_v16 = vpop.f32.mrb[0].mxu0 }
  0xed   :  { %v117_v17 = vadd.f32 %v346_v12, %v116_v16  ;;  %v370_v18 = vpop.f32.mrb[1].mxu0 }
  0xef   :  { %v120_v19 = vmax.f32 %v117_v17, 0.0 }
  0xf1   :  { %380 = vmatmul.mubr.msk.f32.vlgmr.msra.gmra.mrb[0].mxu1 %vm128_vm2, %v120_v19 }
 0x1c4   :  { %v198_v24 = vpop.f32.mrb[0].mxu1 }
 0x1c5   :  { %v199_v25 = vadd.f32 %v198_v24, %v126_v23  ;;  %v381_v26 = vpop.f32.mrb[1].mxu1 }
 0x1c7   :  { %v202_v27 = vmax.f32 %v199_v25, 0.0 }
 0x1c9   :  { %391 = vmatmul.mubr.msk.f32.vlgmr.msra.gmra.mrb[2].mxu0 %vm128_vm2, %v202_v27 }
 0x29c   :  { %v279_v29 = vpop.f32.mrb[2].mxu0 }
 0x29d   :  { %v280_v30 = vadd.f32 %v279_v29, %v208_v28  ;;  %v392_v31 = vpop.f32.mrb[3].mxu0 }
 0x29f   :  { %v283_v32 = vmax.f32 %v280_v30, -20.0 }
 0x2a1   :  { %v284_v33 = vmin.f32 %v283_v32, 2.0 }
 0x2a3   :  { %v286_v34 = vmul.f32 1.442695, %v284_v33 }
 0x2a5   :  { %416 = vpow2.f32 %v286_v34 }
 0x2af   :  { %v417_v35 = vpop.eup %416 }
 0x2b0   :  { %289 = vrot.lane.b32.xlu1 %v417_v35, %s478_s4 }
 0x2b4   :  { %316 = vrot.lane.b32.xlu1 %v284_v33, %s478_s4 }
 0x322   :  { %v290_v37 = vpop.permute.xlu1 %289 }
 0x323   :  { %v292_v38 = vmul.f32 %v290_v37, %v285_v36 }
 0x325   :  { %v293_v39 = vadd.f32 %v292_v38, %v280_v30 }
 0x326   :  { %v317_v52 = vpop.permute.xlu1 %316 }
 0x327   :  { %v297_v40 = vmul.f32 -2.0, %v293_v39  ;;  %v319_v57 = vsub.f32 %v295_v51, %v317_v52  ;;  %v296_v58 = vsub.f32 0.6931472, %v293_v39 }
 0x329   :  { %v299_v41 = vand.u32 2147483647, %v297_v40  ;;  %v298_v55 = vmax.f32 %v297_v40, 0.0  ;;  %v350_v61 = vadd.f32 -0.9189385, %v319_v57 }
 0x32b   :  { %v300_v42 = vsub.f32 0.0, %v299_v41 }
 0x32d   :  { %v301_v43 = vmul.f32 1.442695, %v300_v42 }
 0x32f   :  { %418 = vpow2.f32 %v301_v43 }
 0x339   :  { %v419_v44 = vpop.eup %418 }
 0x33a   :  { %v303_v45 = vadd.f32 1.0, %v419_v44  ;;  %v306_v46 = vmul.f32 -0.5, %v419_v44  ;;  %v309_v49 = vand.u32 2147483647, %v419_v44 }
 0x33c   :  { %420 = vlog2.f32 %v303_v45  ;;  %v307_v48 = vadd.f32 1.0, %v306_v46  ;;  %vm310_vm3 = vcmp.lt.f32.partialorder %v309_v49, 0.0004427343 }
 0x33d   :  { %422 = vtanh.f32 %v293_v39 }
 0x33e   :  { %v308_v54 = vmul.f32 %v419_v44, %v307_v48 }
 0x346   :  { %v421_v50 = vpop.eup %420 }
 0x347   :  { %v305_v53 = vmul.f32 0.6931472, %v421_v50  ;;  %v423_v1 = vpop.eup %422 }
 0x348   :  { %v327_v2 = vmul.f32 2.0, %v423_v1 }
 0x349   :  { %v311_v56 = vsel %vm310_vm3, %v308_v54, %v305_v53 }
 0x34a   :  { %v312_v59 = vadd.f32 %v311_v56, %v298_v55 }
 0x34c   :  { %v313_v60 = vsub.f32 %v296_v58, %v312_v59 }
 0x34e   :  { %v314_v62 = vmul.f32 2.0, %v313_v60 }
 0x350   :  { %v321_v63 = vsub.f32 %v350_v61, %v314_v62 }
 0x352   :  { %v323_v0 = vsel %vm322_vm4, %v321_v63, 0.0 }
 0x353   :  { %324 = vadd.xlane.f32.xlu0 %v323_v0 }
 0x3e0   :  { %v325_v3 = vpop.xlane.xlu0 %324 }
 0x3e1   :  { %v328_v4 = vsel %vm322_vm4, %v327_v2, %v325_v3 }
 0x3e2   :  { %330 = vst.msk [vmem:[#allocation5] sm:$0xff] %vm329_vm5, %v328_v4 }
 0x3e3   :  { %457 = shalt.err (!%p454_p12)
}
 0x3e4   :  { %s458_s11 = scalar_lea.hbm %s584_s6, 128 }
 0x3e5   :  { %p459_p13 = scmp.ne.s32.totalorder %s584_s6, %s458_s11  ;;  %p462_p0 = scmp.lt.u32.totalorder %s458_s11, %s584_s6 }
 0x3e7   :  { %p464_p1 = pnand %p462_p0, %p459_p13 }
 0x3e9   :  { %467 = shalt.err (!%p464_p1)
}
 0x3ea   :  { %340 = dma.vmem_to_hbm [thread:$0]  %s338_s7, 128, %s584_s6, [#allocation4]  }
 0x3eb   :  { %470 = dma.done.wait [#allocation4], 128  }
 0x3ec   :  { %471 = vsyncadd [#allocation4], 4294967168 }
 0x3ed   :  { %344 = vsyncpa [#allocation3], 1 }
 0x3ee   :  { %345 = vsyncpa [#allocation4], 1 }

</bundles_post_ra>
